<compile_context>
chip_gen: v6e
topology: v6e:2x2x1
jax: 0.10.0
libtpu: 0.0.40
codegen_flags: <defaults>
</compile_context>

<pallas_src>
import functools
import math

import jax
import jax.numpy as jnp
from jax.experimental import pallas as pl
from jax.experimental.pallas import tpu as pltpu

# MXU operand dtype (f32 accumulation is kept via preferred_element_type).
_MXU_DTYPE = jnp.bfloat16
# Scoped VMEM cap: v5e/v6e have 128 MiB physical (32 MiB scoped default); v7x has 64 MiB.
_VMEM_LIMIT = 64 * 1024 * 1024
_NEG_INF = -1e9


# ---------------- in-kernel helpers (all f32) ----------------
def _ln_rows(x, gamma, beta, eps):
    """Row-wise LayerNorm over the last axis. gamma/beta are (1, D)."""
    mu = jnp.mean(x, axis=-1, keepdims=True)
    var = jnp.mean(jnp.square(x - mu), axis=-1, keepdims=True)
    return (x - mu) * jax.lax.rsqrt(var + eps) * gamma + beta


def _erf_f32(x):
    # Abramowitz & Stegun 7.1.26 polynomial, |err| < 1.5e-7: matches PyTorch's exact-erf
    # F.gelu far below bf16-matmul noise, using only ops with guaranteed Mosaic lowerings.
    ax = jnp.abs(x)
    t = 1.0 / (1.0 + 0.3275911 * ax)
    poly = ((((1.061405429 * t - 1.453152027) * t + 1.421413741) * t
             - 0.284496736) * t + 0.254829592) * t
    y = 1.0 - poly * jnp.exp(-ax * ax)
    return jnp.where(x >= 0, y, -y)


def _gelu_exact(x):
    return 0.5 * x * (1.0 + _erf_f32(x * 0.7071067811865476))


# ---------------- shared K/V projection (optionally with kv-side LayerNorm) ----------------
def _kv_proj_kernel(x_ref, g_ref, b_ref, wk_ref, bk_ref, wv_ref, bv_ref,
                    k_ref, v_ref, *, eps, apply_ln):
    x = x_ref[...].astype(jnp.float32)
    if apply_ln:
        x = _ln_rows(x, g_ref[...], b_ref[...], eps)
    xb = x.astype(_MXU_DTYPE)
    k = jnp.dot(xb, wk_ref[...], preferred_element_type=jnp.float32) + bk_ref[...]
    v = jnp.dot(xb, wv_ref[...], preferred_element_type=jnp.float32) + bv_ref[...]
    k_ref[...] = k.astype(k_ref.dtype)
    v_ref[...] = v.astype(v_ref.dtype)


def fused_kv_proj(x, wk, bk, wv, bv, *, ln=None, eps=1e-5, block_rows=512):
    """K/V projection (+ optional LayerNorm on the kv input), row-tiled.

    Computed ONCE per attention type and shared by the query and content streams
    (perf review: hoist the duplicated KV projections).  Outputs are bf16.
    """
    B, T, D = x.shape
    N = B * T
    x2 = x.reshape(N, D)
    if ln is None:
        g = jnp.ones((D,), jnp.float32)
        b = jnp.zeros((D,), jnp.float32)
        apply_ln = False
    else:
        g, b = ln
        apply_ln = True
    bm = N if N <= block_rows else block_rows
    const2 = lambda i: (0, 0)
    k2, v2 = pl.pallas_call(
        functools.partial(_kv_proj_kernel, eps=eps, apply_ln=apply_ln),
        grid=(pl.cdiv(N, bm),),
        in_specs=[
            pl.BlockSpec((bm, D), lambda i: (i, 0)),   # kv-input rows
            pl.BlockSpec((1, D), const2),              # LN gamma (unused if apply_ln=False)
            pl.BlockSpec((1, D), const2),              # LN beta
            pl.BlockSpec((D, D), const2),              # Wk (bf16, resident)
            pl.BlockSpec((1, D), const2),              # bk
            pl.BlockSpec((D, D), const2),              # Wv (bf16, resident)
            pl.BlockSpec((1, D), const2),              # bv
        ],
        out_specs=[pl.BlockSpec((bm, D), lambda i: (i, 0)),
                   pl.BlockSpec((bm, D), lambda i: (i, 0))],
        out_shape=[jax.ShapeDtypeStruct((N, D), _MXU_DTYPE),
                   jax.ShapeDtypeStruct((N, D), _MXU_DTYPE)],
        compiler_params=pltpu.CompilerParams(
            dimension_semantics=("parallel",),
            vmem_limit_bytes=_VMEM_LIMIT,
        ),
    )(x2, g.reshape(1, D), b.reshape(1, D), wk, bk.reshape(1, D), wv, bv.reshape(1, D))
    return k2.reshape(B, T, D), v2.reshape(B, T, D)


# ---------------- fused pre-LN multi-head attention + residual ----------------
def _attn_kernel(*refs, nhead, eps, has_amask, has_kpm):
    n_in = 9 + int(has_amask) + int(has_kpm)
    (qin_ref, k_ref, v_ref, gq_ref, bgq_ref,
     wq_ref, bq_ref, wo_ref, bo_ref) = refs[:9]
    amask_ref = refs[9] if has_amask else None
    kpm_ref = refs[9 + int(has_amask)] if has_kpm else None
    o_ref = refs[n_in]
    ctx_ref = refs[n_in + 1]                       # (tq, D) f32 VMEM scratch (concat'd heads)

    D = qin_ref.shape[2]
    dh = D // nhead

    x_raw = qin_ref[0].astype(jnp.float32)         # (tq, D) -- also the residual
    xn = _ln_rows(x_raw, gq_ref[...], bgq_ref[...], eps)
    # NOTE: 1/sqrt(dh) is folded into Wq/bq at parameter-prep time (no activation scaling here).
    q = jnp.dot(xn.astype(_MXU_DTYPE), wq_ref[...],
                preferred_element_type=jnp.float32) + bq_ref[...]
    q = q.astype(_MXU_DTYPE)                       # (tq, D)
    k = k_ref[0]                                   # (T, D) bf16 (precomputed)
    v = v_ref[0]                                   # (T, D) bf16 (precomputed)

    # Combined additive mask, built once per grid step and only if masks exist at all.
    mask = None
    if has_amask and has_kpm:
        mask = amask_ref[...] + kpm_ref[0]
    elif has_amask:
        mask = amask_ref[...]
    elif has_kpm:
        mask = kpm_ref[0]

    # TODO(synk): dh-granular column slices below are lane-misaligned when dh < 128; a
    # head-major K/V layout (or dh padded to 128) would remove the per-head relayouts.
    for h in range(nhead):
        sl = slice(h * dh, (h + 1) * dh)
        s = jax.lax.dot_general(q[:, sl], k[:, sl], (((1,), (1,)), ((), ())),
                                preferred_element_type=jnp.float32)      # (tq, T)
        if mask is not None:
            s = s + mask
        s = s - jnp.max(s, axis=-1, keepdims=True)
        p = jnp.exp(s)
        p = p * pl.reciprocal(jnp.sum(p, axis=-1, keepdims=True), approx=True)
        ctx_ref[:, sl] = jnp.dot(p.astype(_MXU_DTYPE), v[:, sl],
                                 preferred_element_type=jnp.float32)     # (tq, dh)

    # Single full-depth (tq,D)x(D,D) out-projection over the concatenated per-head contexts
    # (replaces nhead K=dh GEMMs + accumulator read-modify-write passes).
    out = x_raw + jnp.dot(ctx_ref[...].astype(_MXU_DTYPE), wo_ref[...],
                          preferred_element_type=jnp.float32) + bo_ref[...]
    o_ref[0] = out.astype(o_ref.dtype)


def fused_attn(q_in, k, v, attn, nhead, *, q_ln, attn_mask=None, key_padding_mask=None,
               eps=1e-5, q_block=256):
    """Pre-LN MHA with residual:  q_in + OutProj(MHA(LN(q_in), k, v)).

    k/v are precomputed (B, T, D) bf16 projections from fused_kv_proj.  Grid is
    (batch, query-row tile), both "parallel"; weights/biases/LN params use constant
    index_maps and stay resident across the grid; K/V stay resident across q tiles.
    """
    B, S, D = q_in.shape
    T = k.shape[1]
    if D % nhead != 0:
        raise ValueError("d_model must be divisible by nhead")
    gq, bq_ln = q_ln
    has_amask = attn_mask is not None
    has_kpm = key_padding_mask is not None

    tq = S if S <= q_block else q_block
    nq = pl.cdiv(S, tq)
    const2 = lambda b, i: (0, 0)

    # TODO(synk): on v7x, mark the resident weight specs single-buffered
    # (pipeline_mode=pl.Buffered(1)) to halve their VMEM footprint.
    in_specs = [
        pl.BlockSpec((1, tq, D), lambda b, i: (b, i, 0)),   # q_in rows (also residual)
        pl.BlockSpec((1, T, D), lambda b, i: (b, 0, 0)),    # K (bf16)
        pl.BlockSpec((1, T, D), lambda b, i: (b, 0, 0)),    # V (bf16)
        pl.BlockSpec((1, D), const2),                       # q-side LN gamma
        pl.BlockSpec((1, D), const2),                       # q-side LN beta
        pl.BlockSpec((D, D), const2),                       # Wq (pre-scaled, bf16, resident)
        pl.BlockSpec((1, D), const2),                       # bq (pre-scaled)
        pl.BlockSpec((D, D), const2),                       # Wo (bf16, resident)
        pl.BlockSpec((1, D), const2),                       # bo
    ]
    args = [q_in, k, v, gq.reshape(1, D), bq_ln.reshape(1, D),
            attn["wq"], attn["bq"].reshape(1, D), attn["wo"], attn["bo"].reshape(1, D)]
    if has_amask:
        if attn_mask.dtype == jnp.bool_:
            amask = jnp.where(attn_mask, _NEG_INF, 0.0).astype(jnp.float32)
        else:
            amask = attn_mask.astype(jnp.float32)
        in_specs.append(pl.BlockSpec((tq, T), lambda b, i: (i, 0)))
        args.append(amask)
    if has_kpm:
        kpm = jnp.where(key_padding_mask, _NEG_INF, 0.0).astype(jnp.float32).reshape(B, 1, T)
        in_specs.append(pl.BlockSpec((1, 1, T), lambda b, i: (b, 0, 0)))
        args.append(kpm)

    kernel = functools.partial(_attn_kernel, nhead=nhead, eps=eps,
                               has_amask=has_amask, has_kpm=has_kpm)
    return pl.pallas_call(
        kernel,
        grid=(B, nq),
        in_specs=in_specs,
        out_specs=pl.BlockSpec((1, tq, D), lambda b, i: (b, i, 0)),
        out_shape=jax.ShapeDtypeStruct((B, S, D), jnp.float32),
        scratch_shapes=[pltpu.VMEM((tq, D), jnp.float32)],   # concatenated per-head context
        compiler_params=pltpu.CompilerParams(
            dimension_semantics=("parallel", "parallel"),
            vmem_limit_bytes=_VMEM_LIMIT,
        ),
    )(*args)


# ---------------- fused pre-LN FFN block: x + W2(gelu(W1(LN(x)))) ----------------
def _ffn_kernel(x_ref, g_ref, b_ref, w1_ref, b1_ref, w2_ref, b2_ref, o_ref, *, eps):
    x = x_ref[...].astype(jnp.float32)
    xn = _ln_rows(x, g_ref[...], b_ref[...], eps)
    h = jnp.dot(xn.astype(_MXU_DTYPE), w1_ref[...],
                preferred_element_type=jnp.float32) + b1_ref[...]
    h = _gelu_exact(h)                              # matches PyTorch F.gelu (exact erf form)
    y = jnp.dot(h.astype(_MXU_DTYPE), w2_ref[...],
                preferred_element_type=jnp.float32) + b2_ref[...]
    o_ref[...] = (x + y).astype(o_ref.dtype)


def fused_ffn(x, ln, w1, b1, w2, b2, *, eps=1e-5, block_rows=512):
    # TODO(synk): add an F-tiled "arbitrary" reduction axis for very large dim_feedforward
    # on v7x instead of keeping both W1 and W2 fully resident.
    B, S, D = x.shape
    N = B * S
    F = w1.shape[1]
    x2 = x.reshape(N, D)
    bm = N if N <= block_rows else block_rows
    const2 = lambda i: (0, 0)
    out = pl.pallas_call(
        functools.partial(_ffn_kernel, eps=eps),
        grid=(pl.cdiv(N, bm),),
        in_specs=[
            pl.BlockSpec((bm, D), lambda i: (i, 0)),   # x rows (also residual)
            pl.BlockSpec((1, D), const2),              # LN gamma
            pl.BlockSpec((1, D), const2),              # LN beta
            pl.BlockSpec((D, F), const2),              # W1 (bf16, resident)
            pl.BlockSpec((1, F), const2),              # b1
            pl.BlockSpec((F, D), const2),              # W2 (bf16, resident)
            pl.BlockSpec((1, D), const2),              # b2
        ],
        out_specs=pl.BlockSpec((bm, D), lambda i: (i, 0)),
        out_shape=jax.ShapeDtypeStruct((N, D), jnp.float32),
        compiler_params=pltpu.CompilerParams(
            dimension_semantics=("parallel",),
            vmem_limit_bytes=_VMEM_LIMIT,
        ),
    )(x2, ln[0].reshape(1, D), ln[1].reshape(1, D),
      w1, b1.reshape(1, F), w2, b2.reshape(1, D))
    return out.reshape(B, S, D)


# ---------------- DecoderLayer forward ----------------
def decoder_layer_forward(params, query, content, memory, nhead,
                          query_mask=None, content_mask=None,
                          content_key_padding_mask=None, update_content=True,
                          layer_norm_eps=1e-5):
    sa, ca = params["self_attn"], params["cross_attn"]
    norm_q = (params["norm_q_w"], params["norm_q_b"])
    norm_c = (params["norm_c_w"], params["norm_c_b"])
    norm1 = (params["norm1_w"], params["norm1_b"])
    norm2 = (params["norm2_w"], params["norm2_b"])

    # Shared K/V projections: identical for the query and content streams, so compute once.
    k_self, v_self = fused_kv_proj(content, sa["wk"], sa["bk"], sa["wv"], sa["bv"],
                                   ln=norm_c, eps=layer_norm_eps)
    k_cross, v_cross = fused_kv_proj(memory, ca["wk"], ca["bk"], ca["wv"], ca["bv"],
                                     ln=None, eps=layer_norm_eps)   # memory already LN'd by ViT

    # TODO(synk): dropout / dropout1/2/3 and attention dropout are eval-mode identities here.
    def stream(tgt, q_ln, tgt_mask, kpm):
        # 1) pre-LN self-attention + residual (kv = norm_c(content), precomputed above)
        t = fused_attn(tgt, k_self, v_self, sa, nhead, q_ln=q_ln,
                       attn_mask=tgt_mask, key_padding_mask=kpm, eps=layer_norm_eps)
        # 2) pre-LN cross-attention + residual (no masks -> mask DMA and adds skipped)
        t = fused_attn(t, k_cross, v_cross, ca, nhead, q_ln=norm1,
                       attn_mask=None, key_padding_mask=None, eps=layer_norm_eps)
        # 3) pre-LN FFN + residual (norm2 fused in-kernel)
        t = fused_ffn(t, norm2, params["linear1_w"], params["linear1_b"],
                      params["linear2_w"], params["linear2_b"], eps=layer_norm_eps)
        return t

    query_out = stream(query, norm_q, query_mask, content_key_padding_mask)
    content_out = content
    if update_content:
        content_out = stream(content, norm_c, content_mask, content_key_padding_mask)
    return query_out, content_out


# ---------------- deterministic parameter init (kernel-ready layout) ----------------
def init_params(key, d_model, nhead, dim_feedforward):
    """Weights are (D_in, D_out), matmul weights in bf16, softmax scale folded into Wq/bq.

    Loading from the PyTorch nn.MultiheadAttention / nn.Linear modules:
      wq = in_proj_weight[:D].T * dh**-0.5   bq = in_proj_bias[:D] * dh**-0.5
      wk = in_proj_weight[D:2D].T            bk = in_proj_bias[D:2D]
      wv = in_proj_weight[2D:].T             bv = in_proj_bias[2D:]
      wo = out_proj.weight.T                 bo = out_proj.bias
      linearN_w = linearN.weight.T           linearN_b = linearN.bias
    """
    ks = iter(jax.random.split(key, 24))
    dh = d_model // nhead
    scale = 1.0 / math.sqrt(dh)

    def uni(shape, fan_in):
        bound = 1.0 / math.sqrt(fan_in)
        return jax.random.uniform(next(ks), shape, jnp.float32, minval=-bound, maxval=bound)

    def mha_params():
        return dict(
            wq=(uni((d_model, d_model), d_model) * scale).astype(_MXU_DTYPE),
            bq=uni((d_model,), d_model) * scale,
            wk=uni((d_model, d_model), d_model).astype(_MXU_DTYPE),
            bk=uni((d_model,), d_model),
            wv=uni((d_model, d_model), d_model).astype(_MXU_DTYPE),
            bv=uni((d_model,), d_model),
            wo=uni((d_model, d_model), d_model).astype(_MXU_DTYPE),
            bo=uni((d_model,), d_model),
        )

    p = {"self_attn": mha_params(), "cross_attn": mha_params()}
    p["linear1_w"] = uni((d_model, dim_feedforward), d_model).astype(_MXU_DTYPE)
    p["linear1_b"] = uni((dim_feedforward,), d_model)
    p["linear2_w"] = uni((dim_feedforward, d_model), dim_feedforward).astype(_MXU_DTYPE)
    p["linear2_b"] = uni((d_model,), dim_feedforward)
    for name in ("norm1", "norm2", "norm_q", "norm_c"):
        p[name + "_w"] = jnp.ones((d_model,), jnp.float32)
        p[name + "_b"] = jnp.zeros((d_model,), jnp.float32)
    return p


if __name__ == "__main__":
    d_model, nhead, dim_ff = 32, 4, 64
    B, S, T_mem = 2, 8, 12

    key = jax.random.PRNGKey(0)
    kp, kq, kc, km = jax.random.split(key, 4)
    params = init_params(kp, d_model, nhead, dim_ff)
    query = jax.random.normal(kq, (B, S, d_model), jnp.float32)
    content = jax.random.normal(kc, (B, S, d_model), jnp.float32)
    memory = jax.random.normal(km, (B, T_mem, d_model), jnp.float32)

    # causal masks (float additive, PyTorch attn_mask semantics) + one padded content position
    causal = jnp.where(jnp.triu(jnp.ones((S, S), jnp.bool_), k=1), _NEG_INF, 0.0
                       ).astype(jnp.float32)
    content_key_padding_mask = jnp.zeros((B, S), jnp.bool_).at[1, -1].set(True)

    q_out, c_out = decoder_layer_forward(
        params, query, content, memory, nhead,
        query_mask=causal, content_mask=causal,
        content_key_padding_mask=content_key_padding_mask,
        update_content=True,
    )
    jax.block_until_ready((q_out, c_out))
    assert q_out.shape == (B, S, d_model) and c_out.shape == (B, S, d_model)
    assert bool(jnp.all(jnp.isfinite(q_out))) and bool(jnp.all(jnp.isfinite(c_out)))
    print("KERNEL_OK")
</pallas_src>

<mosaic_0001>
module attributes {stable_mosaic.version = 11 : i64} {
  func.func @_kv_proj_kernel(%arg0: i32, %arg1: memref<16x32xf32, #tpu.memory_space<vmem>>, %arg2: memref<1x32xf32, #tpu.memory_space<vmem>>, %arg3: memref<1x32xf32, #tpu.memory_space<vmem>>, %arg4: memref<32x32xbf16, #tpu.memory_space<vmem>>, %arg5: memref<1x32xf32, #tpu.memory_space<vmem>>, %arg6: memref<32x32xbf16, #tpu.memory_space<vmem>>, %arg7: memref<1x32xf32, #tpu.memory_space<vmem>>, %arg8: memref<16x32xbf16, #tpu.memory_space<vmem>>, %arg9: memref<16x32xbf16, #tpu.memory_space<vmem>>) attributes {dimension_semantics = [#tpu.dimension_semantics<parallel>], iteration_bounds = array<i64: 1>, scalar_prefetch = 0 : i64, scratch_operands = 0 : i64, tpu.core_type = #tpu.core_type<tc>, window_params = [{transform_indices = @transform_0, window_bounds = array<i64: 16, 32>}, {pipeline_mode = #tpu.pipeline_mode<synchronous>, transform_indices = @transform_1, window_bounds = array<i64: 1, 32>}, {pipeline_mode = #tpu.pipeline_mode<synchronous>, transform_indices = @transform_2, window_bounds = array<i64: 1, 32>}, {pipeline_mode = #tpu.pipeline_mode<synchronous>, transform_indices = @transform_3, window_bounds = array<i64: 32, 32>}, {pipeline_mode = #tpu.pipeline_mode<synchronous>, transform_indices = @transform_4, window_bounds = array<i64: 1, 32>}, {pipeline_mode = #tpu.pipeline_mode<synchronous>, transform_indices = @transform_5, window_bounds = array<i64: 32, 32>}, {pipeline_mode = #tpu.pipeline_mode<synchronous>, transform_indices = @transform_6, window_bounds = array<i64: 1, 32>}, {transform_indices = @transform_7, window_bounds = array<i64: 16, 32>}, {transform_indices = @transform_8, window_bounds = array<i64: 16, 32>}]} {
    %c0 = arith.constant 0 : index
    %c0_0 = arith.constant 0 : index
    %0 = vector.load %arg1[%c0, %c0_0] : memref<16x32xf32, #tpu.memory_space<vmem>>, vector<16x32xf32>
    %c0_1 = arith.constant 0 : index
    %c0_2 = arith.constant 0 : index
    %1 = vector.load %arg2[%c0_1, %c0_2] : memref<1x32xf32, #tpu.memory_space<vmem>>, vector<1x32xf32>
    %c0_3 = arith.constant 0 : index
    %c0_4 = arith.constant 0 : index
    %2 = vector.load %arg3[%c0_3, %c0_4] : memref<1x32xf32, #tpu.memory_space<vmem>>, vector<1x32xf32>
    %cst = arith.constant dense<0.000000e+00> : vector<16xf32>
    %3 = vector.multi_reduction <add>, %0, %cst [1] : vector<16x32xf32> to vector<16xf32>
    %4 = vector.shape_cast %3 : vector<16xf32> to vector<16x1xf32>
    %cst_5 = arith.constant 3.200000e+01 : f32
    %5 = vector.broadcast %cst_5 : f32 to vector<16x1xf32>
    %6 = arith.divf %4, %5 : vector<16x1xf32>
    %7 = vector.broadcast %6 : vector<16x1xf32> to vector<16x32xf32>
    %8 = arith.subf %0, %7 : vector<16x32xf32>
    %9 = arith.mulf %8, %8 : vector<16x32xf32>
    %cst_6 = arith.constant dense<0.000000e+00> : vector<16xf32>
    %10 = vector.multi_reduction <add>, %9, %cst_6 [1] : vector<16x32xf32> to vector<16xf32>
    %11 = vector.shape_cast %10 : vector<16xf32> to vector<16x1xf32>
    %cst_7 = arith.constant 3.200000e+01 : f32
    %12 = vector.broadcast %cst_7 : f32 to vector<16x1xf32>
    %13 = arith.divf %11, %12 : vector<16x1xf32>
    %14 = vector.broadcast %6 : vector<16x1xf32> to vector<16x32xf32>
    %15 = arith.subf %0, %14 : vector<16x32xf32>
    %cst_8 = arith.constant 9.99999974E-6 : f32
    %16 = vector.broadcast %cst_8 : f32 to vector<16x1xf32>
    %17 = arith.addf %13, %16 : vector<16x1xf32>
    %18 = math.rsqrt %17 : vector<16x1xf32>
    %19 = vector.broadcast %18 : vector<16x1xf32> to vector<16x32xf32>
    %20 = arith.mulf %15, %19 : vector<16x32xf32>
    %21 = vector.broadcast %1 : vector<1x32xf32> to vector<16x32xf32>
    %22 = arith.mulf %20, %21 : vector<16x32xf32>
    %23 = vector.broadcast %2 : vector<1x32xf32> to vector<16x32xf32>
    %24 = arith.addf %22, %23 : vector<16x32xf32>
    %25 = arith.truncf %24 : vector<16x32xf32> to vector<16x32xbf16>
    %c0_9 = arith.constant 0 : index
    %c0_10 = arith.constant 0 : index
    %26 = vector.load %arg4[%c0_9, %c0_10] : memref<32x32xbf16, #tpu.memory_space<vmem>>, vector<32x32xbf16>
    %cst_11 = arith.constant dense<0.000000e+00> : vector<16x32xf32>
    %27 = tpu.matmul %25, %26, %cst_11 {dimension_numbers = #tpu.dot_dimension_numbers<[1], [0], [0], [1], [0, 0, 1, 1], [], []>} : vector<16x32xbf16>, vector<32x32xbf16>, vector<16x32xf32> -> vector<16x32xf32>
    %c0_12 = arith.constant 0 : index
    %c0_13 = arith.constant 0 : index
    %28 = vector.load %arg5[%c0_12, %c0_13] : memref<1x32xf32, #tpu.memory_space<vmem>>, vector<1x32xf32>
    %29 = vector.broadcast %28 : vector<1x32xf32> to vector<16x32xf32>
    %30 = arith.addf %27, %29 : vector<16x32xf32>
    %c0_14 = arith.constant 0 : index
    %c0_15 = arith.constant 0 : index
    %31 = vector.load %arg6[%c0_14, %c0_15] : memref<32x32xbf16, #tpu.memory_space<vmem>>, vector<32x32xbf16>
    %cst_16 = arith.constant dense<0.000000e+00> : vector<16x32xf32>
    %32 = tpu.matmul %25, %31, %cst_16 {dimension_numbers = #tpu.dot_dimension_numbers<[1], [0], [0], [1], [0, 0, 1, 1], [], []>} : vector<16x32xbf16>, vector<32x32xbf16>, vector<16x32xf32> -> vector<16x32xf32>
    %c0_17 = arith.constant 0 : index
    %c0_18 = arith.constant 0 : index
    %33 = vector.load %arg7[%c0_17, %c0_18] : memref<1x32xf32, #tpu.memory_space<vmem>>, vector<1x32xf32>
    %34 = vector.broadcast %33 : vector<1x32xf32> to vector<16x32xf32>
    %35 = arith.addf %32, %34 : vector<16x32xf32>
    %36 = arith.truncf %30 : vector<16x32xf32> to vector<16x32xbf16>
    %c0_19 = arith.constant 0 : index
    %c0_20 = arith.constant 0 : index
    %37 = vector.load %arg8[%c0_19, %c0_20] : memref<16x32xbf16, #tpu.memory_space<vmem>>, vector<16x32xbf16>
    tpu.vector_store %arg8[%c0_19, %c0_20], %36 {strides = array<i32>} : memref<16x32xbf16, #tpu.memory_space<vmem>>, vector<16x32xbf16>,
    %38 = arith.truncf %35 : vector<16x32xf32> to vector<16x32xbf16>
    %c0_21 = arith.constant 0 : index
    %c0_22 = arith.constant 0 : index
    %39 = vector.load %arg9[%c0_21, %c0_22] : memref<16x32xbf16, #tpu.memory_space<vmem>>, vector<16x32xbf16>
    tpu.vector_store %arg9[%c0_21, %c0_22], %38 {strides = array<i32>} : memref<16x32xbf16, #tpu.memory_space<vmem>>, vector<16x32xbf16>,
    return
  }
  func.func @transform_0(%arg0: i32) -> (i32, i32) {
    %c0_i32 = arith.constant 0 : i32
    %c0_i32_0 = arith.constant 0 : i32
    return %arg0, %c0_i32 : i32, i32
  }
  func.func @transform_1(%arg0: i32) -> (i32, i32) {
    %c0_i32 = arith.constant 0 : i32
    %c0_i32_0 = arith.constant 0 : i32
    %c0_i32_1 = arith.constant 0 : i32
    return %c0_i32, %c0_i32_0 : i32, i32
  }
  func.func @transform_2(%arg0: i32) -> (i32, i32) {
    %c0_i32 = arith.constant 0 : i32
    %c0_i32_0 = arith.constant 0 : i32
    %c0_i32_1 = arith.constant 0 : i32
    return %c0_i32, %c0_i32_0 : i32, i32
  }
  func.func @transform_3(%arg0: i32) -> (i32, i32) {
    %c0_i32 = arith.constant 0 : i32
    %c0_i32_0 = arith.constant 0 : i32
    %c0_i32_1 = arith.constant 0 : i32
    return %c0_i32, %c0_i32_0 : i32, i32
  }
  func.func @transform_4(%arg0: i32) -> (i32, i32) {
    %c0_i32 = arith.constant 0 : i32
    %c0_i32_0 = arith.constant 0 : i32
    %c0_i32_1 = arith.constant 0 : i32
    return %c0_i32, %c0_i32_0 : i32, i32
  }
  func.func @transform_5(%arg0: i32) -> (i32, i32) {
    %c0_i32 = arith.constant 0 : i32
    %c0_i32_0 = arith.constant 0 : i32
    %c0_i32_1 = arith.constant 0 : i32
    return %c0_i32, %c0_i32_0 : i32, i32
  }
  func.func @transform_6(%arg0: i32) -> (i32, i32) {
    %c0_i32 = arith.constant 0 : i32
    %c0_i32_0 = arith.constant 0 : i32
    %c0_i32_1 = arith.constant 0 : i32
    return %c0_i32, %c0_i32_0 : i32, i32
  }
  func.func @transform_7(%arg0: i32) -> (i32, i32) {
    %c0_i32 = arith.constant 0 : i32
    %c0_i32_0 = arith.constant 0 : i32
    return %arg0, %c0_i32 : i32, i32
  }
  func.func @transform_8(%arg0: i32) -> (i32, i32) {
    %c0_i32 = arith.constant 0 : i32
    %c0_i32_0 = arith.constant 0 : i32
    return %arg0, %c0_i32 : i32, i32
  }
}

</mosaic_0001>

<bundles_post_ra>
// kernel: tpu_custom_call.1
= control target key start
LH: loop header
LB: loop body
LE: loop exit
PB: predicated region body
PF: predicated region fallthrough
CT: control target
= control target key end

     0   :  { %14 = vsyncpa [#allocation3], 0  ;;  %s579_s0 = inlined_call_operand.hbm [shape: f32[16,32], index: 0, kind: input, shape index: {}]   ;;  %s580_s1 = inlined_call_operand.vmem [shape: f32[1,32], index: 1, kind: input, shape index: {}]   ;;  %s581_s2 = inlined_call_operand.vmem [shape: f32[1,32], index: 2, kind: input, shape index: {}]   ;;  %s582_s3 = inlined_call_operand.hbm [shape: bf16[32,32], index: 3, kind: input, shape index: {}]   ;;  %s583_s4 = inlined_call_operand.vmem [shape: f32[1,32], index: 4, kind: input, shape index: {}]   ;;  %s584_s5 = inlined_call_operand.hbm [shape: bf16[32,32], index: 5, kind: input, shape index: {}]   ;;  %s585_s6 = inlined_call_operand.vmem [shape: f32[1,32], index: 6, kind: input, shape index: {}]   ;;  %s586_s7 = inlined_call_operand.hbm [shape: bf16[16,32], index: 7, kind: output, shape index: {0}]   ;;  %s587_s8 = inlined_call_operand.hbm [shape: bf16[16,32], index: 8, kind: output, shape index: {1}]  }
   0x1   :  { %15 = vsyncpa [#allocation6], 0 }
   0x2   :  { %16 = vsyncpa [#allocation4], 0 }
   0x3   :  { %17 = vsyncpa [#allocation10], 0  ;;  %s474_s27 = smov [#allocation5]  }
   0x4   :  { %s39_s28 = sshll.u32 %s474_s27, 4  ;;  %s40_s28 = int_to_ptr.vmem [resolvable:$true] %s39_s28 }
   0x5   :  { %s374_s29 = scalar_lea.vmem %s40_s28, 256  ;;  %p379_p1 = scmp.lt.s32.totalorder %s40_s28, %s40_s28 }
   0x6   :  { %p375_p0 = scmp.ne.s32.totalorder %s40_s28, %s374_s29  ;;  %p380_p2 = scmp.lt.s32.totalorder %s374_s29, %s374_s29 }
   0x8   :  { %p381_p3 = por %p380_p2, %p379_p1 }
   0xa   :  { %p382_p4 = pnand %p381_p3, %p375_p0 }
   0xc   :  { %385 = shalt.err (!%p382_p4)
}
   0xd   :  { %s475_s30 = smov 64   ;;  %s476_s9 = smov 4  }
   0xe   :  { %45 = dma.hbm_to_vmem [thread:$0]  %s582_s3, 256, %s40_s28, [#allocation6], %s475_s30, %s475_s30, %s476_s9  }
   0xf   :  { %s477_s12 = smov [#allocation2]  }
  0x10   :  { %s23_s13 = sshll.u32 %s477_s12, 4  ;;  %s24_s13 = int_to_ptr.vmem [resolvable:$true] %s23_s13 }
  0x11   :  { %s394_s14 = scalar_lea.vmem %s24_s13, 256  ;;  %p399_p6 = scmp.lt.s32.totalorder %s24_s13, %s24_s13 }
  0x12   :  { %p395_p5 = scmp.ne.s32.totalorder %s24_s13, %s394_s14  ;;  %p400_p7 = scmp.lt.s32.totalorder %s394_s14, %s394_s14 }
  0x14   :  { %p401_p8 = por %p400_p7, %p399_p6 }
  0x16   :  { %p402_p9 = pnand %p401_p8, %p395_p5 }
  0x18   :  { %405 = shalt.err (!%p402_p9)
}
  0x19   :  { %s478_s15 = smov 128   ;;  %s479_s16 = smov 8  }
  0x1a   :  { %29 = dma.hbm_to_vmem [thread:$0]  %s579_s0, 256, %s24_s13, [#allocation3], %s478_s15, %s478_s15, %s479_s16  }
  0x1b   :  { %s480_s19 = smov [#allocation7]  }
  0x1c   :  { %s53_s20 = sshll.u32 %s480_s19, 4  ;;  %s54_s20 = int_to_ptr.vmem [resolvable:$true] %s53_s20 }
  0x1d   :  { %s414_s3 = scalar_lea.vmem %s54_s20, 256  ;;  %p419_p11 = scmp.lt.s32.totalorder %s54_s20, %s54_s20 }
  0x1e   :  { %p415_p10 = scmp.ne.s32.totalorder %s54_s20, %s414_s3  ;;  %p420_p12 = scmp.lt.s32.totalorder %s414_s3, %s414_s3 }
  0x20   :  { %p421_p13 = por %p420_p12, %p419_p11 }
  0x22   :  { %p422_p0 = pnand %p421_p13, %p415_p10 }
  0x24   :  { %425 = shalt.err (!%p422_p0)
}
  0x25   :  { %59 = dma.hbm_to_vmem [thread:$0]  %s584_s5, 256, %s54_s20, [#allocation6], %s475_s30, %s475_s30, %s476_s9  }
  0x26   :  { %466 = dma.done.wait [#allocation3], 256  }
  0x27   :  { %467 = vsyncadd [#allocation3], 4294967040 }
  0x28   :  { %468 = dma.done.wait [#allocation6], 512  }
  0x29   :  { %469 = vsyncadd [#allocation6], 4294966784  ;;  %vm76_vm0 = vcmask 261120   ;;  %v72_v0 = vld [vmem:[#allocation2] sm:$0xff]  ;;  %v73_v1 = vld [vmem:[#allocation2 + $0x8] sm:$0xff]  ;;  %v481_v16 = vmov 0.0  }
  0x2a   :  { %v77_v2 = vsel %vm76_vm0, %v72_v0, 0.0  ;;  %v80_v3 = vsel %vm76_vm0, %v73_v1, 0.0  ;;  %v358_v14 = vld [vmem:[#allocation5 + $0x8] sm:$0xff]   ;;  %v359_v15 = vld [vmem:[#allocation7 + $0x8] sm:$0xff]   ;;  %331 = vmatprep.subr.bf16.mxu0 %v481_v16  ;;  %339 = vmatprep.subr.bf16.mxu1 %v481_v16  ;;  %v360_v17 = vld [vmem:[#allocation5] sm:$0xff]   ;;  %vm482_vm1 = vmmov 0  }
  0x2b   :  { %78 = vadd.xlane.f32.xlu0 %v77_v2  ;;  %332 = vmatpush3.bf16.msra.mxu0 %v358_v14  ;;  %v361_v18 = vld [vmem:[#allocation7] sm:$0xff]   ;;  %vm260_vm2 = vcmask 257024  }
  0x2c   :  { %340 = vmatpush3.bf16.msra.mxu1 %v359_v15  ;;  %333 = vmatprep.subr.bf16.mxu0 %v481_v16  ;;  %v307_v27 = vld [vmem:[%s580_s1] ss:$0 sm:$0xff] }
  0x2d   :  { %341 = vmatprep.subr.bf16.mxu1 %v481_v16  ;;  %335 = vmatprep.mubr.msk.bf16.mxu0 %vm482_vm1, %v481_v16  ;;  %v308_v31 = vld [vmem:[%s581_s2] ss:$0 sm:$0xff]  ;;  %s483_s2 = smov [#allocation8]  }
  0x2e   :  { %343 = vmatprep.mubr.msk.bf16.mxu1 %vm482_vm1, %v481_v16  ;;  %v309_v36 = vld [vmem:[%s583_s4] ss:$0 sm:$0xff]  ;;  %s278_s28 = sshll.u32 %s483_s2, 4  ;;  %s484_s4 = smov [#allocation9]   ;;  %s279_s28 = int_to_ptr.vmem [resolvable:$true] %s278_s28 }
  0x2f   :  { %81 = vadd.xlane.f32.xlu0 %v80_v3  ;;  %334 = vmatpush3.bf16.msra.mxu0 %v360_v17  ;;  %v313_v37 = vld [vmem:[%s585_s6] ss:$0 sm:$0xff]  ;;  %s290_s6 = sshll.u32 %s484_s4, 4  ;;  %s426_s29 = scalar_lea.vmem %s279_s28, 128  ;;  %s291_s6 = int_to_ptr.vmem [resolvable:$true] %s290_s6 }
  0x30   :  { %342 = vmatpush3.bf16.msra.mxu1 %v361_v18  ;;  %p427_p1 = scmp.ne.s32.totalorder %s279_s28, %s426_s29  ;;  %p431_p2 = scmp.lt.s32.totalorder %s279_s28, %s279_s28 }
  0x31   :  { %p432_p3 = scmp.lt.s32.totalorder %s426_s29, %s426_s29 }
  0x33   :  { %p433_p4 = por %p432_p3, %p431_p2 }
  0x35   :  { %p434_p5 = pnand %p433_p4, %p427_p1 }
  0xb4   :  { %v79_v4 = vpop.xlane.xlu0 %78 }
  0xb5   :  { %v84_v5 = vmul.f32 0.03125, %v79_v4 }
  0xb7   :  { %v86_v6 = vsub.f32 %v72_v0, %v84_v5 }
  0xb8   :  { %v82_v7 = vpop.xlane.xlu0 %81 }
  0xb9   :  { %v85_v8 = vmul.f32 0.03125, %v82_v7  ;;  %v88_v9 = vmul.f32 %v86_v6, %v86_v6 }
  0xbb   :  { %v87_v10 = vsub.f32 %v73_v1, %v85_v8  ;;  %v90_v11 = vsel %vm76_vm0, %v88_v9, 0.0 }
  0xbc   :  { %91 = vadd.xlane.f32.xlu1 %v90_v11 }
  0xbd   :  { %v89_v12 = vmul.f32 %v87_v10, %v87_v10 }
  0xbf   :  { %v93_v13 = vsel %vm76_vm0, %v89_v12, 0.0 }
  0xc0   :  { %94 = vadd.xlane.f32.xlu1 %v93_v13 }
 0x145   :  { %v92_v19 = vpop.xlane.xlu1 %91 }
 0x146   :  { %v96_v20 = vmul.f32 0.03125, %v92_v19 }
 0x148   :  { %v98_v21 = vadd.f32 1e-05, %v96_v20 }
 0x149   :  { %v95_v22 = vpop.xlane.xlu1 %94 }
 0x14a   :  { %362 = vrsqrt.f32 %v98_v21  ;;  %v97_v23 = vmul.f32 0.03125, %v95_v22 }
 0x14c   :  { %v99_v24 = vadd.f32 1e-05, %v97_v23 }
 0x14e   :  { %364 = vrsqrt.f32 %v99_v24 }
 0x157   :  { %v363_v25 = vpop.eup %362 }
 0x158   :  { %v102_v26 = vmul.f32 %v363_v25, %v86_v6 }
 0x15a   :  { %v110_v30 = vmul.f32 %v307_v27, %v102_v26 }
 0x15b   :  { %v365_v28 = vpop.eup %364 }
 0x15c   :  { %v103_v29 = vmul.f32 %v365_v28, %v87_v10  ;;  %v118_v33 = vadd.f32 %v308_v31, %v110_v30 }
 0x15e   :  { %v111_v32 = vmul.f32 %v307_v27, %v103_v29 }
 0x160   :  { %v119_v34 = vadd.f32 %v308_v31, %v111_v32 }
 0x162   :  { %v120_v35 = vpack.c.bf16 %v119_v34, %v118_v33 }
 0x164   :  { %336 = vmatmul.mubr.msk.bf16.vlgmr.msra.gmra.mxu0 %vm76_vm0, %v120_v35  ;;  %344 = vmatmul.mubr.msk.bf16.vlgmr.msra.gmra.mxu1 %vm76_vm0, %v120_v35 }
 0x224   :  { %v181_v38 = vpop.f32.mrf.mxu0  ;;  %v245_v39 = vpop.f32.mrf.mxu1 }
 0x225   :  { %v182_v40 = vadd.f32 %v309_v36, %v181_v38  ;;  %v246_v41 = vadd.f32 %v313_v37, %v245_v39 }
 0x226   :  { %v337_v42 = vpop.f32.mrf.mxu0  ;;  %v345_v43 = vpop.f32.mrf.mxu1 }
 0x227   :  { %v321_v44 = vpack.c.bf16 %v182_v40, %v182_v40  ;;  %v323_v45 = vpack.c.bf16 %v246_v41, %v246_v41 }
 0x228   :  { %v184_v46 = vpop.f32.mrf.mxu0  ;;  %v248_v47 = vpop.f32.mrf.mxu1 }
 0x229   :  { %v185_v48 = vadd.f32 %v309_v36, %v184_v46  ;;  %v249_v49 = vadd.f32 %v313_v37, %v248_v47  ;;  %261 = vst.msk [vmem:[#allocation8] sm:$0xf] %vm260_vm2, %v321_v44  ;;  %271 = vst.msk [vmem:[#allocation9] sm:$0xf] %vm260_vm2, %v323_v45 }
 0x22a   :  { %v338_v50 = vpop.f32.mrf.mxu0  ;;  %v346_v51 = vpop.f32.mrf.mxu1 }
 0x22b   :  { %v322_v52 = vpack.c.bf16 %v185_v48, %v185_v48  ;;  %v324_v53 = vpack.c.bf16 %v249_v49, %v249_v49 }
 0x22d   :  { %262 = vst.msk [vmem:[#allocation8 + $0x4] sm:$0xf] %vm260_vm2, %v322_v52  ;;  %272 = vst.msk [vmem:[#allocation9 + $0x4] sm:$0xf] %vm260_vm2, %v324_v53 }
 0x22e   :  { %437 = shalt.err (!%p434_p5)
}
 0x22f   :  { %284 = dma.vmem_to_hbm [thread:$0]  %s279_s28, 128, %s586_s7, [#allocation4], %s475_s30, %s475_s30, %s476_s9  }
 0x230   :  { %s446_s12 = scalar_lea.vmem %s291_s6, 128  ;;  %p451_p7 = scmp.lt.s32.totalorder %s291_s6, %s291_s6 }
 0x231   :  { %p447_p6 = scmp.ne.s32.totalorder %s291_s6, %s446_s12  ;;  %p452_p8 = scmp.lt.s32.totalorder %s446_s12, %s446_s12 }
 0x233   :  { %p453_p9 = por %p452_p8, %p451_p7 }
 0x235   :  { %p454_p10 = pnand %p453_p9, %p447_p6 }
 0x237   :  { %457 = shalt.err (!%p454_p10)
}
 0x238   :  { %296 = dma.vmem_to_hbm [thread:$0]  %s291_s6, 128, %s587_s8, [#allocation10], %s475_s30, %s475_s30, %s476_s9  }
 0x239   :  { %470 = dma.done.wait [#allocation4], 128  }
 0x23a   :  { %471 = vsyncadd [#allocation4], 4294967168 }
 0x23b   :  { %472 = dma.done.wait [#allocation10], 128  }
 0x23c   :  { %473 = vsyncadd [#allocation10], 4294967168 }
 0x23d   :  { %303 = vsyncpa [#allocation3], 1 }
 0x23e   :  { %304 = vsyncpa [#allocation6], 1 }
 0x23f   :  { %305 = vsyncpa [#allocation4], 1 }
 0x240   :  { %306 = vsyncpa [#allocation10], 1 }

</bundles_post_ra>
